<compile_context>
chip_gen: v6e
topology: v6e:2x2x1
jax: 0.10.0
libtpu: 0.0.40
codegen_flags: <defaults>
</compile_context>

<pallas_src>
import functools

import jax
import jax.numpy as jnp
from jax.experimental import pallas as pl
from jax.experimental.pallas import tpu as pltpu

_K_CHUNK = 256  # MXU-native K on v6e/v7x; two passes on v5e's 128-wide MXU.


def _embed_kernel(labels_ref, table_ref, out_ref, *, k_chunk: int):
    # labels_ref: (TN, 1)  int32, VMEM
    # table_ref : (R, D)   f32/bf16, VMEM, resident (R = padded num_labels)
    # out_ref   : (TN, D)  output dtype (f32 for the PyTorch-equivalent path)
    labels = labels_ref[...]                                   # (TN, 1)
    tn = labels.shape[0]
    rows, embed_dim = table_ref.shape

    if rows <= k_chunk:
        # Small vocabulary: single one-hot matmul, no K loop.
        ids = jax.lax.broadcasted_iota(jnp.int32, (tn, rows), 1)
        onehot = (labels == ids).astype(table_ref.dtype)
        acc = jnp.dot(onehot, table_ref[...],
                      preferred_element_type=jnp.float32)
    else:
        # Large vocabulary: K-tile the one-hot so the (TN, K) intermediate is
        # bounded to one chunk (keeps vreg/VMEM pressure low).
        n_chunks = rows // k_chunk                             # rows % k_chunk == 0

        def body(c, acc):
            start = pl.multiple_of(c * k_chunk, k_chunk)
            ids = start + jax.lax.broadcasted_iota(jnp.int32, (tn, k_chunk), 1)
            onehot = (labels == ids).astype(table_ref.dtype)
            chunk = table_ref[pl.ds(start, k_chunk), :]
            return acc + jnp.dot(onehot, chunk,
                                 preferred_element_type=jnp.float32)

        acc = jax.lax.fori_loop(
            0, n_chunks, body,
            jnp.zeros((tn, embed_dim), jnp.float32),
            unroll=min(n_chunks, 8))

    out_ref[...] = acc.astype(out_ref.dtype)


def _vmem_capacity_bytes() -> int:
    """Physical per-core VMEM; conservative 64 MiB if the query is unavailable."""
    try:
        return int(pltpu.get_tpu_info().vmem_capacity_bytes)
    except Exception:
        return 64 << 20


def label_embedding(labels: jax.Array, table: jax.Array, *,
                    tile_n: int | None = None,
                    use_bf16_table: bool = False) -> jax.Array:
    """Pallas equivalent of LabelEmbedding.forward(labels)."""
    orig_shape = labels.shape
    num_labels, embed_dim = table.shape
    out_dtype = table.dtype

    table_k = table.astype(jnp.bfloat16) if use_bf16_table else table

    # Pad the vocabulary axis to a multiple of the K chunk so every in-kernel
    # slice is aligned.  Padded rows are all-zero and never selected by a
    # valid label.
    rows = num_labels
    if num_labels > _K_CHUNK:
        pad = (-num_labels) % _K_CHUNK
        if pad:
            table_k = jnp.pad(table_k, ((0, pad), (0, 0)))
        rows = num_labels + pad

    flat = labels.reshape(-1, 1).astype(jnp.int32)             # (N, 1)
    n = flat.shape[0]
    n8 = pl.cdiv(n, 8) * 8

    itemsize = table_k.dtype.itemsize
    table_bytes = rows * embed_dim * itemsize                  # single-buffered

    vmem_cap = _vmem_capacity_bytes()
    vmem_ceiling = (vmem_cap * 3) // 4          # ≈48 MiB on v7x, ≈96 MiB on v5e/v6e

    # Adaptive output tile: 512-1024 row slabs get close to the HBM roofline;
    # 256 floor keeps per-step overhead (~0.35us) amortized; tiny N stays a
    # single (masked) block rather than splitting the grid.
    if tile_n is None:
        tile_n = 1024 if n >= 4096 else (512 if n >= 1024 else 256)
    tn = max(8, min(tile_n, n8))

    def _budget(t: int) -> int:
        out_blk = t * embed_dim * 4
        lab_blk = t * 4
        onehot = t * min(rows, _K_CHUNK) * itemsize
        return table_bytes + 2 * (out_blk + lab_blk) + onehot + (4 << 20)

    while tn > 8 and _budget(tn) > vmem_ceiling:
        tn = max(8, (tn // 2 + 7) // 8 * 8)

    grid = (pl.cdiv(n, tn),)
    vmem_limit = int(min(vmem_ceiling, max(32 << 20, _budget(tn))))

    cost = pl.CostEstimate(
        flops=2 * n * num_labels * embed_dim,
        transcendentals=0,
        bytes_accessed=table_bytes + n * 4 + n * embed_dim * 4,
    )

    kernel = functools.partial(_embed_kernel, k_chunk=_K_CHUNK)

    def _call(table_spec):
        return pl.pallas_call(
            kernel,
            out_shape=jax.ShapeDtypeStruct((n, embed_dim), out_dtype),
            grid_spec=pltpu.PrefetchScalarGridSpec(
                num_scalar_prefetch=0,
                grid=grid,
                in_specs=[
                    pl.BlockSpec((tn, 1), lambda i: (i, 0)),
                    table_spec,
                ],
                out_specs=pl.BlockSpec((tn, embed_dim), lambda i: (i, 0)),
            ),
            compiler_params=pltpu.CompilerParams(
                dimension_semantics=("parallel",),
                vmem_limit_bytes=vmem_limit,
            ),
            cost_estimate=cost,
        )(flat, table_k)

    try:
        # Table block never changes (constant index_map) -> keep it single
        # buffered; the second pipeline buffer would be pure VMEM waste.
        out = _call(pl.BlockSpec((rows, embed_dim), lambda i: (0, 0),
                                 pipeline_mode=pl.Buffered(1)))
    except Exception:
        # Fallback for Pallas versions that reject Buffered(1) on a
        # pallas_call operand: default (double-buffered) spec, still correct.
        out = _call(pl.BlockSpec((rows, embed_dim), lambda i: (0, 0)))

    return out.reshape(*orig_shape, embed_dim)


if __name__ == "__main__":
    key = jax.random.PRNGKey(0)
    k_table, k_labels, k_labels2, k_table3, k_labels3 = jax.random.split(key, 5)

    num_labels = 16
    embed_dim = 128
    batch, seq = 2, 8

    # nn.Embedding default init: weight ~ N(0, 1)
    table = jax.random.normal(k_table, (num_labels, embed_dim), dtype=jnp.float32)
    labels = jax.random.randint(k_labels, (batch, seq), 0, num_labels, dtype=jnp.int32)

    out = jax.block_until_ready(label_embedding(labels, table))
    ref = table[labels]
    assert out.shape == (batch, seq, embed_dim)
    assert jnp.allclose(out, ref, atol=1e-6), "mismatch vs reference gather"

    # Ragged-N case (N not a multiple of 8 / tile): exercises masked boundary block.
    labels2 = jax.random.randint(k_labels2, (3, 7), 0, num_labels, dtype=jnp.int32)
    out2 = jax.block_until_ready(label_embedding(labels2, table))
    assert out2.shape == (3, 7, embed_dim)
    assert jnp.allclose(out2, table[labels2], atol=1e-6), "mismatch on ragged N"

    # Larger vocabulary (> 256): exercises the K-chunked one-hot path.
    table3 = jax.random.normal(k_table3, (300, embed_dim), dtype=jnp.float32)
    labels3 = jax.random.randint(k_labels3, (2, 5), 0, 300, dtype=jnp.int32)
    out3 = jax.block_until_ready(label_embedding(labels3, table3))
    assert out3.shape == (2, 5, embed_dim)
    assert jnp.allclose(out3, table3[labels3], atol=1e-6), "mismatch on K-chunked path"

    print("KERNEL_OK")
</pallas_src>

<mosaic_0001>
module attributes {stable_mosaic.version = 11 : i64} {
  func.func @_embed_kernel(%arg0: i32, %arg1: memref<16x1xi32, #tpu.memory_space<vmem>>, %arg2: memref<16x128xf32, #tpu.memory_space<vmem>>, %arg3: memref<16x128xf32, #tpu.memory_space<vmem>>) attributes {dimension_semantics = [#tpu.dimension_semantics<parallel>], iteration_bounds = array<i64: 1>, scalar_prefetch = 0 : i64, scratch_operands = 0 : i64, tpu.core_type = #tpu.core_type<tc>, window_params = [{transform_indices = @transform_0, window_bounds = array<i64: 16, 1>}, {pipeline_mode = #tpu.pipeline_mode<synchronous>, transform_indices = @transform_1, window_bounds = array<i64: 16, 128>}, {transform_indices = @transform_2, window_bounds = array<i64: 16, 128>}]} {
    %c0 = arith.constant 0 : index
    %c0_0 = arith.constant 0 : index
    %0 = vector.load %arg1[%c0, %c0_0] : memref<16x1xi32, #tpu.memory_space<vmem>>, vector<16x1xi32>
    %1 = tpu.iota {dimensions = array<i32: 1>} : vector<16x16xi32>
    %2 = vector.broadcast %0 : vector<16x1xi32> to vector<16x16xi32>
    %3 = arith.cmpi eq, %2, %1 : vector<16x16xi32>
    %4 = arith.extui %3 : vector<16x16xi1> to vector<16x16xi32>
    %5 = arith.sitofp %4 : vector<16x16xi32> to vector<16x16xf32>
    %c0_1 = arith.constant 0 : index
    %c0_2 = arith.constant 0 : index
    %6 = vector.load %arg2[%c0_1, %c0_2] : memref<16x128xf32, #tpu.memory_space<vmem>>, vector<16x128xf32>
    %cst = arith.constant dense<0.000000e+00> : vector<16x128xf32>
    %7 = tpu.matmul %5, %6, %cst {dimension_numbers = #tpu.dot_dimension_numbers<[1], [0], [0], [1], [0, 0, 1, 1], [], []>} : vector<16x16xf32>, vector<16x128xf32>, vector<16x128xf32> -> vector<16x128xf32>
    %c0_3 = arith.constant 0 : index
    %c0_4 = arith.constant 0 : index
    %8 = vector.load %arg3[%c0_3, %c0_4] : memref<16x128xf32, #tpu.memory_space<vmem>>, vector<16x128xf32>
    tpu.vector_store %arg3[%c0_3, %c0_4], %7 {strides = array<i32>} : memref<16x128xf32, #tpu.memory_space<vmem>>, vector<16x128xf32>,
    return
  }
  func.func @transform_0(%arg0: i32) -> (i32, i32) {
    %c0_i32 = arith.constant 0 : i32
    %c0_i32_0 = arith.constant 0 : i32
    return %arg0, %c0_i32 : i32, i32
  }
  func.func @transform_1(%arg0: i32) -> (i32, i32) {
    %c0_i32 = arith.constant 0 : i32
    %c0_i32_0 = arith.constant 0 : i32
    %c0_i32_1 = arith.constant 0 : i32
    return %c0_i32, %c0_i32_0 : i32, i32
  }
  func.func @transform_2(%arg0: i32) -> (i32, i32) {
    %c0_i32 = arith.constant 0 : i32
    %c0_i32_0 = arith.constant 0 : i32
    return %arg0, %c0_i32 : i32, i32
  }
}

module attributes {stable_mosaic.version = 11 : i64} {
  func.func @_embed_kernel(%arg0: i32, %arg1: memref<16x1xi32, #tpu.memory_space<vmem>>, %arg2: memref<16x128xf32, #tpu.memory_space<vmem>>, %arg3: memref<16x128xf32, #tpu.memory_space<vmem>>) attributes {dimension_semantics = [#tpu.dimension_semantics<parallel>], iteration_bounds = array<i64: 1>, scalar_prefetch = 0 : i64, scratch_operands = 0 : i64, tpu.core_type = #tpu.core_type<tc>, window_params = [{transform_indices = @transform_0, window_bounds = array<i64: 16, 1>}, {pipeline_mode = #tpu.pipeline_mode<synchronous>, transform_indices = @transform_1, window_bounds = array<i64: 16, 128>}, {transform_indices = @transform_2, window_bounds = array<i64: 16, 128>}]} {
    %c0 = arith.constant 0 : index
    %c0_0 = arith.constant 0 : index
    %0 = vector.load %arg1[%c0, %c0_0] : memref<16x1xi32, #tpu.memory_space<vmem>>, vector<16x1xi32>
    %1 = tpu.iota {dimensions = array<i32: 1>} : vector<16x16xi32>
    %2 = vector.broadcast %0 : vector<16x1xi32> to vector<16x16xi32>
    %3 = arith.cmpi eq, %2, %1 : vector<16x16xi32>
    %4 = arith.extui %3 : vector<16x16xi1> to vector<16x16xi32>
    %5 = arith.sitofp %4 : vector<16x16xi32> to vector<16x16xf32>
    %c0_1 = arith.constant 0 : index
    %c0_2 = arith.constant 0 : index
    %6 = vector.load %arg2[%c0_1, %c0_2] : memref<16x128xf32, #tpu.memory_space<vmem>>, vector<16x128xf32>
    %cst = arith.constant dense<0.000000e+00> : vector<16x128xf32>
    %7 = tpu.matmul %5, %6, %cst {dimension_numbers = #tpu.dot_dimension_numbers<[1], [0], [0], [1], [0, 0, 1, 1], [], []>} : vector<16x16xf32>, vector<16x128xf32>, vector<16x128xf32> -> vector<16x128xf32>
    %c0_3 = arith.constant 0 : index
    %c0_4 = arith.constant 0 : index
    %8 = vector.load %arg3[%c0_3, %c0_4] : memref<16x128xf32, #tpu.memory_space<vmem>>, vector<16x128xf32>
    tpu.vector_store %arg3[%c0_3, %c0_4], %7 {strides = array<i32>} : memref<16x128xf32, #tpu.memory_space<vmem>>, vector<16x128xf32>,
    return
  }
  func.func @transform_0(%arg0: i32) -> (i32, i32) {
    %c0_i32 = arith.constant 0 : i32
    %c0_i32_0 = arith.constant 0 : i32
    return %arg0, %c0_i32 : i32, i32
  }
  func.func @transform_1(%arg0: i32) -> (i32, i32) {
    %c0_i32 = arith.constant 0 : i32
    %c0_i32_0 = arith.constant 0 : i32
    %c0_i32_1 = arith.constant 0 : i32
    return %c0_i32, %c0_i32_0 : i32, i32
  }
  func.func @transform_2(%arg0: i32) -> (i32, i32) {
    %c0_i32 = arith.constant 0 : i32
    %c0_i32_0 = arith.constant 0 : i32
    return %arg0, %c0_i32 : i32, i32
  }
}

</mosaic_0001>

<bundles_post_ra>
// kernel: tpu_custom_call.1
= control target key start
LH: loop header
LB: loop body
LE: loop exit
PB: predicated region body
PF: predicated region fallthrough
CT: control target
= control target key end

     0   :  { %v173_v2 = vmov 0   ;;  %s208_s0 = inlined_call_operand.vmem [shape: s32[16,1], index: 0, kind: input, shape index: {}]   ;;  %s209_s1 = inlined_call_operand.vmem [shape: f32[16,128], index: 1, kind: input, shape index: {}]   ;;  %s210_s2 = inlined_call_operand.hbm [shape: f32[16,128], index: 2, kind: output, shape index: {}]  }
   0x1   :  { %v12_v0 = vld [vmem:[%s208_s0] sm:$0xff]  ;;  %v29_v1 = vld [vmem:[%s209_s1 + $0x8] sm:$0xff]  ;;  %150 = vset.pattern.permute.xlu0 %v173_v2 }
   0x2   :  { %138 = vmatprep.subr.mxu0 %v29_v1  ;;  %v28_v3 = vld [vmem:[%s209_s1] sm:$0xff] }
   0x3   :  { %7 = vsyncpa [#allocation3], 0  ;;  %17 = vperm.xlu0 %150, %v12_v0   ;;  %139 = vmatpush3.msra.mxu0 %v29_v1  ;;  %v13_v4 = vld [vmem:[%s208_s0 + $0x8] sm:$0xff]  ;;  %v14_v5 = vlaneseq  ;;  %vm30_vm0 = vcmask 130048   ;;  %v174_v8 = vmov 0.0   ;;  %s175_s1 = smov [#allocation2]  }
   0x4   :  { %140 = vmatprep.subr.mxu0 %v28_v3  ;;  %s119_s17 = sshll.u32 %s175_s1, 4  ;;  %s120_s17 = int_to_ptr.vmem [resolvable:$true] %s119_s17 }
   0x5   :  { %141 = vmatpush3.msra.mxu0 %v28_v3  ;;  %v15_v6 = vand.u32 127, %v14_v5  ;;  %s151_s0 = scalar_lea.vmem %s120_s17, 256  ;;  %p156_p1 = scmp.lt.s32.totalorder %s120_s17, %s120_s17 }
   0x6   :  { %p152_p0 = scmp.ne.s32.totalorder %s120_s17, %s151_s0  ;;  %p157_p2 = scmp.lt.s32.totalorder %s151_s0, %s151_s0 }
   0x7   :  { %20 = vperm.xlu0 %150, %v13_v4  }
   0x8   :  { %p158_p3 = por %p157_p2, %p156_p1 }
   0xa   :  { %p159_p4 = pnand %p158_p3, %p152_p0 }
  0x7e   :  { %v18_v7 = vpop.permute.xlu0 %17 }
  0x7f   :  { %vm22_vm1 = vcmp.eq.s32.totalorder %v18_v7, %v15_v6 }
  0x80   :  { %v130_v9 = vsel %vm22_vm1, 1.0, %v174_v8 }
  0x81   :  { %142 = vmatprep.mubr.msk.f32.mxu0 %vm30_vm0, %v130_v9 }
  0x82   :  { %v21_v10 = vpop.permute.xlu0 %20 }
  0x83   :  { %vm23_vm2 = vcmp.eq.s32.totalorder %v21_v10, %v15_v6 }
  0x84   :  { %v131_v11 = vsel %vm23_vm2, 1.0, %v174_v8 }
  0x85   :  { %143 = vmatmul.mubr.msk.f32.vlgmr.msra.gmra.mxu0 %vm30_vm0, %v131_v11 }
 0x145   :  { %v144_v12 = vpop.f32.mrf.mxu0 }
 0x146   :  { %113 = vst [vmem:[#allocation2 + $0x8] sm:$0xff] %v144_v12 }
 0x147   :  { %v103_v13 = vpop.f32.mrf.mxu0 }
 0x148   :  { %112 = vst [vmem:[#allocation2] sm:$0xff] %v103_v13 }
 0x149   :  { %162 = shalt.err (!%p159_p4)
}
 0x14a   :  { %s176_s18 = smov 128   ;;  %s177_s19 = smov 8  }
 0x14b   :  { %125 = dma.vmem_to_hbm [thread:$0]  %s120_s17, 256, %s210_s2, [#allocation3], %s176_s18, %s176_s18, %s177_s19  }
 0x14c   :  { %171 = dma.done.wait [#allocation3], 256  }
 0x14d   :  { %172 = vsyncadd [#allocation3], 4294967040 }
 0x14e   :  { %129 = vsyncpa [#allocation3], 1 }

// kernel: tpu_custom_call.1
= control target key start
LH: loop header
LB: loop body
LE: loop exit
PB: predicated region body
PF: predicated region fallthrough
CT: control target
= control target key end

     0   :  { %v173_v2 = vmov 0   ;;  %s208_s0 = inlined_call_operand.vmem [shape: s32[16,1], index: 0, kind: input, shape index: {}]   ;;  %s209_s1 = inlined_call_operand.vmem [shape: f32[16,128], index: 1, kind: input, shape index: {}]   ;;  %s210_s2 = inlined_call_operand.hbm [shape: f32[16,128], index: 2, kind: output, shape index: {}]  }
   0x1   :  { %v12_v0 = vld [vmem:[%s208_s0] sm:$0xff]  ;;  %v29_v1 = vld [vmem:[%s209_s1 + $0x8] sm:$0xff]  ;;  %150 = vset.pattern.permute.xlu0 %v173_v2 }
   0x2   :  { %138 = vmatprep.subr.mxu0 %v29_v1  ;;  %v28_v3 = vld [vmem:[%s209_s1] sm:$0xff] }
   0x3   :  { %7 = vsyncpa [#allocation3], 0  ;;  %17 = vperm.xlu0 %150, %v12_v0   ;;  %139 = vmatpush3.msra.mxu0 %v29_v1  ;;  %v13_v4 = vld [vmem:[%s208_s0 + $0x8] sm:$0xff]  ;;  %v14_v5 = vlaneseq  ;;  %vm30_vm0 = vcmask 130048   ;;  %v174_v8 = vmov 0.0   ;;  %s175_s1 = smov [#allocation2]  }
   0x4   :  { %140 = vmatprep.subr.mxu0 %v28_v3  ;;  %s119_s17 = sshll.u32 %s175_s1, 4  ;;  %s120_s17 = int_to_ptr.vmem [resolvable:$true] %s119_s17 }
   0x5   :  { %141 = vmatpush3.msra.mxu0 %v28_v3  ;;  %v15_v6 = vand.u32 127, %v14_v5  ;;  %s151_s0 = scalar_lea.vmem %s120_s17, 256  ;;  %p156_p1 = scmp.lt.s32.totalorder %s120_s17, %s120_s17 }
   0x6   :  { %p152_p0 = scmp.ne.s32.totalorder %s120_s17, %s151_s0  ;;  %p157_p2 = scmp.lt.s32.totalorder %s151_s0, %s151_s0 }
   0x7   :  { %20 = vperm.xlu0 %150, %v13_v4  }
   0x8   :  { %p158_p3 = por %p157_p2, %p156_p1 }
   0xa   :  { %p159_p4 = pnand %p158_p3, %p152_p0 }
  0x7e   :  { %v18_v7 = vpop.permute.xlu0 %17 }
  0x7f   :  { %vm22_vm1 = vcmp.eq.s32.totalorder %v18_v7, %v15_v6 }
  0x80   :  { %v130_v9 = vsel %vm22_vm1, 1.0, %v174_v8 }
  0x81   :  { %142 = vmatprep.mubr.msk.f32.mxu0 %vm30_vm0, %v130_v9 }
  0x82   :  { %v21_v10 = vpop.permute.xlu0 %20 }
  0x83   :  { %vm23_vm2 = vcmp.eq.s32.totalorder %v21_v10, %v15_v6 }
  0x84   :  { %v131_v11 = vsel %vm23_vm2, 1.0, %v174_v8 }
  0x85   :  { %143 = vmatmul.mubr.msk.f32.vlgmr.msra.gmra.mxu0 %vm30_vm0, %v131_v11 }
 0x145   :  { %v144_v12 = vpop.f32.mrf.mxu0 }
 0x146   :  { %113 = vst [vmem:[#allocation2 + $0x8] sm:$0xff] %v144_v12 }
 0x147   :  { %v103_v13 = vpop.f32.mrf.mxu0 }
 0x148   :  { %112 = vst [vmem:[#allocation2] sm:$0xff] %v103_v13 }
 0x149   :  { %162 = shalt.err (!%p159_p4)
}
 0x14a   :  { %s176_s18 = smov 128   ;;  %s177_s19 = smov 8  }
 0x14b   :  { %125 = dma.vmem_to_hbm [thread:$0]  %s120_s17, 256, %s210_s2, [#allocation3], %s176_s18, %s176_s18, %s177_s19  }
 0x14c   :  { %171 = dma.done.wait [#allocation3], 256  }
 0x14d   :  { %172 = vsyncadd [#allocation3], 4294967040 }
 0x14e   :  { %129 = vsyncpa [#allocation3], 1 }

</bundles_post_ra>
